<compile_context>
chip_gen: v5e
topology: v5e:2x2
jax: 0.10.0
libtpu: 0.0.40
codegen_flags: <defaults>
</compile_context>

<pallas_src>
import functools

import jax
import jax.numpy as jnp
import numpy as np
from jax.experimental import pallas as pl
from jax.experimental.pallas import tpu as pltpu


def mlp_kernel(x_ref, w1_ref, b1_ref, wh_ref, bh_ref, wl_ref, bl_ref, o_ref, *, n_layers):
    # First linear (bf16 x bf16 -> f32 accumulate) + bias + ReLU, activations carried in bf16.
    h32 = jnp.dot(x_ref[...], w1_ref[...], preferred_element_type=jnp.float32) + b1_ref[...]
    h = jnp.maximum(h32, 0.0).astype(jnp.bfloat16)

    # Hidden layers: same weights reused (as in the PyTorch module's for-loop).
    # Hoist weight/bias loads out of the loop; only the activation is loop-carried.
    wh = wh_ref[...]
    bh = bh_ref[...]
    if n_layers > 0:
        def body(_, hc):
            t = jnp.dot(hc, wh, preferred_element_type=jnp.float32) + bh
            return jnp.maximum(t, 0.0).astype(jnp.bfloat16)

        h = jax.lax.fori_loop(0, n_layers, body, h, unroll=(n_layers <= 8))

    # Final (H -> 1) layer as VPU multiply + lane reduce; store lane-dense with batch on lanes.
    prod = h.astype(jnp.float32) * wl_ref[...].astype(jnp.float32)   # (batch_tile, H_pad)
    out = jnp.sum(prod, axis=-1)                                     # (batch_tile,)
    o_ref[...] = (out[None, :] + bl_ref[...]).astype(o_ref.dtype)    # (1, batch_tile)


def _round_up(x, m):
    return (x + m - 1) // m * m


def _pad2(a, rows, cols):
    r, c = a.shape
    return jnp.pad(a, ((0, rows - r), (0, cols - c)))


def nn_forward(x, w1, b1, wh, bh, wl, bl, *, n_layers, batch_tile=128):
    """x: (B, n_inputs); w1: (n_inputs, H); b1: (1, H); wh: (H, H); bh: (1, H); wl: (H, 1); bl: (1, 1)."""
    B, n_inputs = x.shape
    H = w1.shape[1]
    assert batch_tile % 128 == 0, "batch_tile must be a multiple of 128 (lane-dense output, bf16 sublanes)"

    K_pad = _round_up(n_inputs, 128)
    H_pad = _round_up(H, 128)
    B_pad = _round_up(B, batch_tile)

    # Zero-pad to lane granularity and cast weights/activations to bf16 (biases stay f32).
    x_p = _pad2(x, B_pad, K_pad).astype(jnp.bfloat16)
    w1_p = _pad2(w1, K_pad, H_pad).astype(jnp.bfloat16)
    b1_p = _pad2(b1.reshape(1, -1), 1, H_pad).astype(jnp.float32)
    wh_p = _pad2(wh, H_pad, H_pad).astype(jnp.bfloat16)
    bh_p = _pad2(bh.reshape(1, -1), 1, H_pad).astype(jnp.float32)
    wl_p = _pad2(wl.reshape(-1, 1).T, 1, H_pad).astype(jnp.bfloat16)   # (1, H_pad)
    bl_p = jnp.asarray(bl, jnp.float32).reshape(1, 1)

    grid = (B_pad // batch_tile,)
    kernel = functools.partial(mlp_kernel, n_layers=n_layers)

    out = pl.pallas_call(
        kernel,
        out_shape=jax.ShapeDtypeStruct((1, B_pad), jnp.float32),
        grid_spec=pl.GridSpec(
            grid=grid,
            in_specs=[
                # x: tiled along batch (sublane), lane dim = padded feature dim
                pl.BlockSpec((batch_tile, K_pad), lambda i: (i, 0)),
                # weights / biases: whole (padded) arrays, constant block across the grid
                pl.BlockSpec((K_pad, H_pad), lambda i: (0, 0)),
                pl.BlockSpec((1, H_pad), lambda i: (0, 0)),
                pl.BlockSpec((H_pad, H_pad), lambda i: (0, 0)),
                pl.BlockSpec((1, H_pad), lambda i: (0, 0)),
                pl.BlockSpec((1, H_pad), lambda i: (0, 0)),
                pl.BlockSpec((1, 1), lambda i: (0, 0)),
            ],
            # lane-dense output: batch mapped to the lane axis
            out_specs=pl.BlockSpec((1, batch_tile), lambda i: (0, i)),
        ),
        compiler_params=pltpu.CompilerParams(
            dimension_semantics=("parallel",),
            vmem_limit_bytes=32 * 1024 * 1024,
        ),
    )(x_p, w1_p, b1_p, wh_p, bh_p, wl_p, bl_p)

    # Back to the module's (B, 1) output layout (pure layout plumbing outside the kernel).
    return out.reshape(B_pad, 1)[:B].astype(x.dtype)


def nn_forward_ref(x, w1, b1, wh, bh, wl, bl, *, n_layers):
    """Pure-JAX reference mirroring the kernel's bf16-weight / f32-accumulate math."""
    xb = x.astype(jnp.bfloat16)
    w1b = w1.astype(jnp.bfloat16)
    whb = wh.astype(jnp.bfloat16)
    h = jnp.dot(xb, w1b, preferred_element_type=jnp.float32) + b1
    h = jnp.maximum(h, 0.0).astype(jnp.bfloat16)
    for _ in range(n_layers):
        h = jnp.dot(h, whb, preferred_element_type=jnp.float32) + bh
        h = jnp.maximum(h, 0.0).astype(jnp.bfloat16)
    wl32 = wl.astype(jnp.bfloat16).astype(jnp.float32)
    return jnp.dot(h.astype(jnp.float32), wl32, preferred_element_type=jnp.float32) + bl


if __name__ == "__main__":
    # Small shapes consistent with the module's forward; B sized to give a 2-step parallel grid.
    B = 256          # batch
    n_inputs = 8     # n_inputs
    H = 32           # n_neurons_per_layer
    n_layers = 3     # number of (shared) hidden-layer applications

    key = jax.random.PRNGKey(0)
    kx, k1, k2, k3, k4, k5, k6 = jax.random.split(key, 7)

    x = jax.random.normal(kx, (B, n_inputs), dtype=jnp.float32)

    # Deterministic parameter init (PyTorch-like uniform(-1/sqrt(fan_in), 1/sqrt(fan_in)))
    def uinit(k, shape, fan_in):
        bound = 1.0 / np.sqrt(fan_in)
        return jax.random.uniform(k, shape, jnp.float32, -bound, bound)

    w1 = uinit(k1, (n_inputs, H), n_inputs)
    b1 = uinit(k2, (1, H), n_inputs)
    wh = uinit(k3, (H, H), H)
    bh = uinit(k4, (1, H), H)
    wl = uinit(k5, (H, 1), H)
    bl = uinit(k6, (1, 1), H)

    out = nn_forward(x, w1, b1, wh, bh, wl, bl, n_layers=n_layers, batch_tile=128)
    out = jax.block_until_ready(out)

    ref = nn_forward_ref(x, w1, b1, wh, bh, wl, bl, n_layers=n_layers)
    np.testing.assert_allclose(np.asarray(out), np.asarray(ref), rtol=2e-3, atol=2e-3)

    print("KERNEL_OK")
</pallas_src>

<mosaic_0001>
module attributes {stable_mosaic.version = 11 : i64} {
  func.func @mlp_kernel(%arg0: i32, %arg1: memref<128x128xbf16, #tpu.memory_space<vmem>>, %arg2: memref<128x128xbf16, #tpu.memory_space<vmem>>, %arg3: memref<1x128xf32, #tpu.memory_space<vmem>>, %arg4: memref<128x128xbf16, #tpu.memory_space<vmem>>, %arg5: memref<1x128xf32, #tpu.memory_space<vmem>>, %arg6: memref<1x128xbf16, #tpu.memory_space<vmem>>, %arg7: memref<1x1xf32, #tpu.memory_space<vmem>>, %arg8: memref<1x128xf32, #tpu.memory_space<vmem>>) attributes {dimension_semantics = [#tpu.dimension_semantics<parallel>], iteration_bounds = array<i64: 2>, scalar_prefetch = 0 : i64, scratch_operands = 0 : i64, tpu.core_type = #tpu.core_type<tc>, window_params = [{transform_indices = @transform_0, window_bounds = array<i64: 128, 128>}, {pipeline_mode = #tpu.pipeline_mode<synchronous>, transform_indices = @transform_1, window_bounds = array<i64: 128, 128>}, {pipeline_mode = #tpu.pipeline_mode<synchronous>, transform_indices = @transform_2, window_bounds = array<i64: 1, 128>}, {pipeline_mode = #tpu.pipeline_mode<synchronous>, transform_indices = @transform_3, window_bounds = array<i64: 128, 128>}, {pipeline_mode = #tpu.pipeline_mode<synchronous>, transform_indices = @transform_4, window_bounds = array<i64: 1, 128>}, {pipeline_mode = #tpu.pipeline_mode<synchronous>, transform_indices = @transform_5, window_bounds = array<i64: 1, 128>}, {pipeline_mode = #tpu.pipeline_mode<synchronous>, transform_indices = @transform_6, window_bounds = array<i64: 1, 1>}, {transform_indices = @transform_7, window_bounds = array<i64: 1, 128>}]} {
    %c0 = arith.constant 0 : index
    %c0_0 = arith.constant 0 : index
    %0 = vector.load %arg1[%c0, %c0_0] : memref<128x128xbf16, #tpu.memory_space<vmem>>, vector<128x128xbf16>
    %c0_1 = arith.constant 0 : index
    %c0_2 = arith.constant 0 : index
    %1 = vector.load %arg2[%c0_1, %c0_2] : memref<128x128xbf16, #tpu.memory_space<vmem>>, vector<128x128xbf16>
    %cst = arith.constant dense<0.000000e+00> : vector<128x128xf32>
    %2 = tpu.matmul %0, %1, %cst {dimension_numbers = #tpu.dot_dimension_numbers<[1], [0], [0], [1], [0, 0, 1, 1], [], []>} : vector<128x128xbf16>, vector<128x128xbf16>, vector<128x128xf32> -> vector<128x128xf32>
    %c0_3 = arith.constant 0 : index
    %c0_4 = arith.constant 0 : index
    %3 = vector.load %arg3[%c0_3, %c0_4] : memref<1x128xf32, #tpu.memory_space<vmem>>, vector<1x128xf32>
    %4 = vector.broadcast %3 : vector<1x128xf32> to vector<128x128xf32>
    %5 = arith.addf %2, %4 : vector<128x128xf32>
    %cst_5 = arith.constant 0.000000e+00 : f32
    %6 = vector.broadcast %cst_5 : f32 to vector<128x128xf32>
    %7 = arith.maximumf %5, %6 : vector<128x128xf32>
    %8 = arith.truncf %7 : vector<128x128xf32> to vector<128x128xbf16>
    %c0_6 = arith.constant 0 : index
    %c0_7 = arith.constant 0 : index
    %9 = vector.load %arg4[%c0_6, %c0_7] : memref<128x128xbf16, #tpu.memory_space<vmem>>, vector<128x128xbf16>
    %c0_8 = arith.constant 0 : index
    %c0_9 = arith.constant 0 : index
    %10 = vector.load %arg5[%c0_8, %c0_9] : memref<1x128xf32, #tpu.memory_space<vmem>>, vector<1x128xf32>
    %c0_i32 = arith.constant 0 : i32
    %cst_10 = arith.constant dense<0.000000e+00> : vector<128x128xf32>
    %11 = tpu.matmul %8, %9, %cst_10 {dimension_numbers = #tpu.dot_dimension_numbers<[1], [0], [0], [1], [0, 0, 1, 1], [], []>} : vector<128x128xbf16>, vector<128x128xbf16>, vector<128x128xf32> -> vector<128x128xf32>
    %12 = vector.broadcast %10 : vector<1x128xf32> to vector<128x128xf32>
    %13 = arith.addf %11, %12 : vector<128x128xf32>
    %cst_11 = arith.constant 0.000000e+00 : f32
    %14 = vector.broadcast %cst_11 : f32 to vector<128x128xf32>
    %15 = arith.maximumf %13, %14 : vector<128x128xf32>
    %16 = arith.truncf %15 : vector<128x128xf32> to vector<128x128xbf16>
    %c1_i32 = arith.constant 1 : i32
    %cst_12 = arith.constant dense<0.000000e+00> : vector<128x128xf32>
    %17 = tpu.matmul %16, %9, %cst_12 {dimension_numbers = #tpu.dot_dimension_numbers<[1], [0], [0], [1], [0, 0, 1, 1], [], []>} : vector<128x128xbf16>, vector<128x128xbf16>, vector<128x128xf32> -> vector<128x128xf32>
    %18 = vector.broadcast %10 : vector<1x128xf32> to vector<128x128xf32>
    %19 = arith.addf %17, %18 : vector<128x128xf32>
    %cst_13 = arith.constant 0.000000e+00 : f32
    %20 = vector.broadcast %cst_13 : f32 to vector<128x128xf32>
    %21 = arith.maximumf %19, %20 : vector<128x128xf32>
    %22 = arith.truncf %21 : vector<128x128xf32> to vector<128x128xbf16>
    %c2_i32 = arith.constant 2 : i32
    %cst_14 = arith.constant dense<0.000000e+00> : vector<128x128xf32>
    %23 = tpu.matmul %22, %9, %cst_14 {dimension_numbers = #tpu.dot_dimension_numbers<[1], [0], [0], [1], [0, 0, 1, 1], [], []>} : vector<128x128xbf16>, vector<128x128xbf16>, vector<128x128xf32> -> vector<128x128xf32>
    %24 = vector.broadcast %10 : vector<1x128xf32> to vector<128x128xf32>
    %25 = arith.addf %23, %24 : vector<128x128xf32>
    %cst_15 = arith.constant 0.000000e+00 : f32
    %26 = vector.broadcast %cst_15 : f32 to vector<128x128xf32>
    %27 = arith.maximumf %25, %26 : vector<128x128xf32>
    %28 = arith.truncf %27 : vector<128x128xf32> to vector<128x128xbf16>
    %29 = arith.extf %28 : vector<128x128xbf16> to vector<128x128xf32>
    %c0_16 = arith.constant 0 : index
    %c0_17 = arith.constant 0 : index
    %30 = vector.load %arg6[%c0_16, %c0_17] : memref<1x128xbf16, #tpu.memory_space<vmem>>, vector<1x128xbf16>
    %31 = arith.extf %30 : vector<1x128xbf16> to vector<1x128xf32>
    %32 = vector.broadcast %31 : vector<1x128xf32> to vector<128x128xf32>
    %33 = arith.mulf %29, %32 : vector<128x128xf32>
    %cst_18 = arith.constant dense<0.000000e+00> : vector<128xf32>
    %34 = vector.multi_reduction <add>, %33, %cst_18 [1] : vector<128x128xf32> to vector<128xf32>
    %35 = vector.shape_cast %34 : vector<128xf32> to vector<1x128xf32>
    %c0_19 = arith.constant 0 : index
    %c0_20 = arith.constant 0 : index
    %36 = vector.load %arg7[%c0_19, %c0_20] : memref<1x1xf32, #tpu.memory_space<vmem>>, vector<1x1xf32>
    %37 = vector.broadcast %36 : vector<1x1xf32> to vector<1x128xf32>
    %38 = arith.addf %35, %37 : vector<1x128xf32>
    %c0_21 = arith.constant 0 : index
    %c0_22 = arith.constant 0 : index
    %39 = vector.load %arg8[%c0_21, %c0_22] : memref<1x128xf32, #tpu.memory_space<vmem>>, vector<1x128xf32>
    tpu.vector_store %arg8[%c0_21, %c0_22], %38 {strides = array<i32>} : memref<1x128xf32, #tpu.memory_space<vmem>>, vector<1x128xf32>,
    return
  }
  func.func @transform_0(%arg0: i32) -> (i32, i32) {
    %c0_i32 = arith.constant 0 : i32
    %c0_i32_0 = arith.constant 0 : i32
    return %arg0, %c0_i32 : i32, i32
  }
  func.func @transform_1(%arg0: i32) -> (i32, i32) {
    %c0_i32 = arith.constant 0 : i32
    %c0_i32_0 = arith.constant 0 : i32
    %c0_i32_1 = arith.constant 0 : i32
    return %c0_i32, %c0_i32_0 : i32, i32
  }
  func.func @transform_2(%arg0: i32) -> (i32, i32) {
    %c0_i32 = arith.constant 0 : i32
    %c0_i32_0 = arith.constant 0 : i32
    %c0_i32_1 = arith.constant 0 : i32
    return %c0_i32, %c0_i32_0 : i32, i32
  }
  func.func @transform_3(%arg0: i32) -> (i32, i32) {
    %c0_i32 = arith.constant 0 : i32
    %c0_i32_0 = arith.constant 0 : i32
    %c0_i32_1 = arith.constant 0 : i32
    return %c0_i32, %c0_i32_0 : i32, i32
  }
  func.func @transform_4(%arg0: i32) -> (i32, i32) {
    %c0_i32 = arith.constant 0 : i32
    %c0_i32_0 = arith.constant 0 : i32
    %c0_i32_1 = arith.constant 0 : i32
    return %c0_i32, %c0_i32_0 : i32, i32
  }
  func.func @transform_5(%arg0: i32) -> (i32, i32) {
    %c0_i32 = arith.constant 0 : i32
    %c0_i32_0 = arith.constant 0 : i32
    %c0_i32_1 = arith.constant 0 : i32
    return %c0_i32, %c0_i32_0 : i32, i32
  }
  func.func @transform_6(%arg0: i32) -> (i32, i32) {
    %c0_i32 = arith.constant 0 : i32
    %c0_i32_0 = arith.constant 0 : i32
    %c0_i32_1 = arith.constant 0 : i32
    return %c0_i32, %c0_i32_0 : i32, i32
  }
  func.func @transform_7(%arg0: i32) -> (i32, i32) {
    %c0_i32 = arith.constant 0 : i32
    %c0_i32_0 = arith.constant 0 : i32
    return %c0_i32, %arg0 : i32, i32
  }
}

</mosaic_0001>

<bundles_post_ra>
// kernel: tpu_custom_call.1
= control target key start
LH: loop header
LB: loop body
LE: loop exit
PB: predicated region body
PF: predicated region fallthrough
CT: control target
= control target key end

     0   :  { %s1802_s0 = inlined_call_operand.hbm [shape: bf16[256,128], index: 0, kind: input, shape index: {}]   ;;  %s1803_s1 = inlined_call_operand.hbm [shape: bf16[128,128], index: 1, kind: input, shape index: {}]   ;;  %s1804_s2 = inlined_call_operand.vmem [shape: f32[1,128], index: 2, kind: input, shape index: {}]   ;;  %s1805_s3 = inlined_call_operand.hbm [shape: bf16[128,128], index: 3, kind: input, shape index: {}]   ;;  %s1806_s4 = inlined_call_operand.vmem [shape: f32[1,128], index: 4, kind: input, shape index: {}]   ;;  %s1807_s5 = inlined_call_operand.vmem [shape: bf16[1,128], index: 5, kind: input, shape index: {}]   ;;  %s1808_s6 = inlined_call_operand.<no memory space> [shape: f32[1,1], index: 6, kind: input, shape index: {}]   ;;  %s1809_s7 = inlined_call_operand.hbm [shape: f32[1,256], index: 7, kind: output, shape index: {}]  }
   0x1   :  { %v12_v0 = vstv %s1808_s6 }
   0x2   :  { %13 = vst [vmem:[#allocation2] sm:$0x1] %v12_v0 }
   0x3   :  { %14 = vsyncpa [#allocation4], 0 }
   0x4   :  { %16 = vsyncpa [#allocation4 + $0x1], 0 }
   0x5   :  { %17 = vsyncpa [#allocation7], 0 }
   0x6   :  { %18 = vsyncpa [#allocation5], 0 }
   0x7   :  { %20 = vsyncpa [#allocation5 + $0x1], 0  ;;  %s1521_s26 = smov 0   ;;  %s1523_s27 = smov 0  }
   0x8   :  { %s1525_s28 = smov 0   ;;  %s1527_s29 = smov 0  }
   0x9 LB: > { %s1542_s6 = sadd.s32 4294967295, %s1471_s29   ;;  %s1103_s30 = sadd.s32 4294967294, %s1471_s29   ;;  %s1471_s29 = sphi %s1527_s29, %s1823_s29   ;;  %s1467_s28 = sphi %s1525_s28, %s1822_s28   ;;  %s1463_s27 = sphi %s1523_s27, %s1821_s27   ;;  %s1459_s26 = sphi %s1521_s26, %s1820_s26  }
   0xa   : > { %p46_p0 = scmp.ne.s32.totalorder %s1463_s27, %s1459_s26  ;;  %p47_p1 = scmp.eq.s32.totalorder %s1542_s6, 0 }
   0xb   : > { %p196_p2 = scmp.eq.s32.totalorder %s1542_s6, 1  ;;  %p202_p3 = scmp.eq.s32.totalorder %s1103_s30, 1 }
   0xc   : > { %p1551_p4 = por %p47_p1, %p46_p0  ;;  %p1104_p5 = scmp.ge.s32.totalorder %s1471_s29, 1 }
   0xd   : > { %p1556_p6 = por %p202_p3, %p46_p0  ;;  %p209_p7 = scmp.lt.s32.totalorder %s1471_s29, 3 }
   0xe   : > { %s220_s12 = sshll.u32 %s1803_s1, 4  ;;  %s1473_s14 = smov [#allocation6]   ;;  %s221_s12 = int_to_ptr.hbm [resolvable:$true] %s220_s12 }
   0xf   : > { %p1564_p8 = pnand %p1104_p5, %p209_p7  ;;  %s222_s15 = sshll.u32 %s1473_s14, 4  ;;  %s223_s15 = int_to_ptr.vmem [resolvable:$true] %s222_s15 }
  0x10   : > { %s237_s18 = sshll.u32 %s1805_s3, 4  ;;  %s1810_s19 = smov 64   ;;  %s238_s18 = int_to_ptr.hbm [resolvable:$true] %s237_s18 }
  0x11   : > { %p1250_p9 = pneg %p1564_p8  ;;  %s1811_s20 = smov 4  }
  0x12   : > { %s1476_s21 = smov [#allocation8]   ;;  %s1583_s23 = sadd.s32 1, %s1471_s29  }
  0x13   : > { %p1251_p10 = pnand %p1250_p9, %p47_p1  ;;  %s239_s22 = sshll.u32 %s1476_s21, 4  ;;  %s240_s22 = int_to_ptr.vmem [resolvable:$true] %s239_s22 }
  0x14   : > { %s33_s24 = sadd.s32 1, %s1467_s28  ;;  %s30_s25 = ssub.s32 %s1471_s29, %s1583_s23 }
  0x15   : > { %1253 = dma.hbm_to_vmem [thread:$0]  (!%p1251_p10), %s221_s12, 1024, %s223_s15, [#allocation7], %s1810_s19, %s1810_s19, %s1811_s20  }
  0x16   : > { %1256 = dma.hbm_to_vmem [thread:$0]  (!%p1251_p10), %s238_s18, 1024, %s240_s22, [#allocation7], %s1810_s19, %s1810_s19, %s1811_s20  }
  0x17   : > { %p40_p12 = scmp.ne.s32.totalorder %s1467_s28, %s1463_s27  ;;  %p31_p13 = scmp.eq.s32.totalorder %s30_s25, 0 }
  0x18   : > { %p41_p0 = scmp.eq.s32.totalorder %s1471_s29, 0  ;;  %p1267_p5 = scmp.lt.s32.totalorder %s1471_s29, 2 }
  0x19   : > { %p1593_p3 = por %p196_p2, %p40_p12  ;;  %s262_s11 = sand.u32 1, %s1467_s28  }
  0x1a   : > { %s1599_s10 = scalar_select %p31_p13, %s1467_s28, %s33_s24  }
  0x1b   : > { %p42_p7 = por %p41_p0, %p40_p12  ;;  %s1108_s12 = sshll.u32 %s262_s11, 6 }
  0x1c   : > { %s1213_s14 = sshll.u32 %s1471_s29, 6  ;;  %s266_s18 = scalar_lea.vmem [#allocation3], %s1108_s12 }
  0x1d   : > { %s271_s17 = scalar_lea.hbm %s1802_s0, %s1213_s14  ;;  %s274_s21 = sshll.u32 %s266_s18, 4  ;;  %s275_s21 = int_to_ptr.vmem [resolvable:$true] %s274_s21 }
  0x1e   : > { %s272_s22 = sshll.u32 %s271_s17, 4  ;;  %p1606_p2 = pnand %p1267_p5, %p42_p7  ;;  %s273_s22 = int_to_ptr.hbm [resolvable:$true] %s272_s22 }
  0x1f   : > { %s263_s24 = scalar_lea.sflag [#allocation4], %s262_s11  ;;  %s1371_s19 = sshra.s32 %s273_s22, 4  ;;  %s1372_s19 = int_to_ptr.hbm [resolvable:$true] %s1371_s19 }
  0x20   : > { %s1373_s20 = scalar_lea.hbm %s1372_s19, 64  ;;  %p1375_p10 = pneg %p1606_p2 }
  0x21   : > { %p1374_p9 = scmp.ne.s32.totalorder %s1372_s19, %s1373_s20  ;;  %s1378_s15 = scalar_lea.hbm %s1802_s0, 128 }
  0x22   : > { %p1379_p0 = scmp.lt.s32.totalorder %s1372_s19, %s1802_s0  ;;  %p1380_p5 = scmp.lt.s32.totalorder %s1378_s15, %s1373_s20 }
  0x23   : > { %p1376_p12 = pnand %p1375_p10, %p1374_p9 }
  0x24   : > { %p1381_p7 = por %p1380_p5, %p1379_p0 }
  0x25   : > { %p1377_p13 = pneg %p1376_p12 }
  0x27   : > { %p1382_p11 = pnand %p1381_p7, %p1377_p13 }
  0x29   : > { %1385 = shalt.err (!%p1382_p11)
}
  0x2a   : > { %s1817_s11 = smov 4   ;;  %s1818_s18 = smov 64  }
  0x2b   : > { %1260 = dma.hbm_to_vmem [thread:$0]  (!%p1606_p2), %s273_s22, 1024, %s275_s21, %s263_s24, %s1818_s18, %s1818_s18, %s1817_s11  }
  0x2c   : > { %286 = sbr.rel (%p1564_p8) target bundleno = 896 (0x380), region = 48  ;;  %s1626_s14 = sand.u32 (!%p1564_p8), 1, %s1463_s27  }
  0x2d   : > { %s1112_s19 = sshll.u32 (!%p1564_p8), %s1626_s14, 6  ;;  %s289_s20 = scalar_lea.sflag (!%p1564_p8), [#allocation4], %s1626_s14 }
  0x2e   : > { %s1630_s12 = scalar_lea.vmem (!%p1564_p8), [#allocation3], %s1112_s19 }
  0x31   : > { %1446 = dma.done.wait (%p1551_p4), %s289_s20, 1024  }
  0x32   : > { %1448 = vsyncadd (%p1551_p4), %s289_s20, 4294966272 }
  0x33   : > { %1450 = dma.done.wait (%p47_p1), [#allocation7], 2048  }
  0x34   : > { %1452 = vsyncadd (%p47_p1), [#allocation7], 4294965248  ;;  %v1229_v1 = vld [vmem:[#allocation6 + $0x38] sm:$0xff]  ;;  %v1228_v2 = vld [vmem:[#allocation6 + $0x30] sm:$0xff]  ;;  %vm945_vm0 = vcmask 130112   ;;  %vm949_vm1 = vcmask 195712   ;;  %s1014_s17 = scalar_lea.hbm %s1809_s7, %s1542_s6 }
  0x35   : > { %466 = vmatpush.bf16.msra.mxu0 %v1229_v1  ;;  %v1227_v3 = vld [vmem:[#allocation6 + $0x28] sm:$0xff]  ;;  %v1226_v4 = vld [vmem:[#allocation6 + $0x20] sm:$0xff]  ;;  %v1225_v5 = vld [vmem:[#allocation6 + $0x18] sm:$0xff]  ;;  %vm953_vm2 = vcmask 261312   ;;  %vm957_vm3 = vcmask 326912   ;;  %vm961_vm4 = vcmask 392512  }
  0x36   : > { %v1224_v6 = vld [vmem:[#allocation6 + $0x10] sm:$0xff]  ;;  %v1223_v7 = vld [vmem:[#allocation6 + $0x8] sm:$0xff]  ;;  %v1222_v8 = vld [vmem:[#allocation6] sm:$0xff]  ;;  %vm965_vm5 = vcmask 458112   ;;  %vm969_vm6 = vcmask 523712   ;;  %vm973_vm7 = vcmask 589312  }
  0x37   : > { %v1214_v9 = vld [vmem:[%s1630_s12] sm:$0xff]  ;;  %v1215_v10 = vld [vmem:[%s1630_s12 + $0x8] sm:$0xff]  ;;  %v1216_v11 = vld [vmem:[%s1630_s12 + $0x10] sm:$0xff]  ;;  %vm977_vm8 = vcmask 654912   ;;  %vm981_vm9 = vcmask 720512   ;;  %vm985_vm10 = vcmask 786112  }
  0x38   : > { %v1217_v12 = vld [vmem:[%s1630_s12 + $0x18] sm:$0xff]  ;;  %v1218_v13 = vld [vmem:[%s1630_s12 + $0x20] sm:$0xff]  ;;  %v1219_v15 = vld [vmem:[%s1630_s12 + $0x28] sm:$0xff]  ;;  %vm989_vm11 = vcmask 851712   ;;  %vm993_vm12 = vcmask 917312   ;;  %vm997_vm13 = vcmask 982912  }
  0x39   : > { %467 = vmatpush.bf16.msra.mxu0 %v1228_v2  ;;  %v1237_v14 = vld [vmem:[#allocation8 + $0x38] sm:$0xff]  ;;  %v1236_v16 = vld [vmem:[#allocation8 + $0x30] sm:$0xff]  ;;  %v1235_v17 = vld [vmem:[#allocation8 + $0x28] sm:$0xff]  ;;  %s332_s11 = scalar_lea.vmem [#allocation9], %s1626_s14  ;;  %s1018_s19 = sshll.u32 %s1014_s17, 4  ;;  %vm1001_vm14 = vcmask 1048512   ;;  %s1019_s19 = int_to_ptr.hbm [resolvable:$true] %s1018_s19 }
  0x3a   : > { %607 = vmatpush.bf16.msra.mxu1 %v1237_v14  ;;  %680 = vmatpush.bf16.msra.mxu2 %v1237_v14  ;;  %v1234_v18 = vld [vmem:[#allocation8 + $0x20] sm:$0xff]  ;;  %v1233_v19 = vld [vmem:[#allocation8 + $0x18] sm:$0xff]  ;;  %v1220_v20 = vld [vmem:[%s1630_s12 + $0x30] sm:$0xff]  ;;  %s1016_s18 = sshll.u32 %s332_s11, 4  ;;  %s1006_s6 = scalar_lea.sflag [#allocation5], %s1626_s14  ;;  %s1017_s18 = int_to_ptr.vmem [resolvable:$true] %s1016_s18 }
  0x3b   : > { %753 = vmatpush.bf16.msra.mxu3 %v1237_v14  ;;  %v1232_v21 = vld [vmem:[#allocation8 + $0x10] sm:$0xff]  ;;  %v1231_v22 = vld [vmem:[#allocation8 + $0x8] sm:$0xff]  ;;  %v1230_v23 = vld [vmem:[#allocation8] sm:$0xff]  ;;  %s1415_s20 = sshra.s32 %s1019_s19, 4  ;;  %s1421_s21 = scalar_lea.hbm %s1809_s7, 2  ;;  %s1416_s20 = int_to_ptr.hbm [resolvable:$true] %s1415_s20 }
  0x3c   : > { %v1221_v24 = vld [vmem:[%s1630_s12 + $0x38] sm:$0xff]  ;;  %s1417_s12 = scalar_lea.hbm %s1416_s20, 1  ;;  %p1422_p11 = scmp.lt.s32.totalorder %s1416_s20, %s1809_s7 }
  0x3d   : > { %468 = vmatpush.bf16.msra.mxu0 %v1227_v3  ;;  %v1309_v26 = vld [vmem:[%s1804_s2] ss:$0 sm:$0xff]  ;;  %p1418_p1 = scmp.ne.s32.totalorder %s1416_s20, %s1417_s12  ;;  %p1423_p2 = scmp.lt.s32.totalorder %s1421_s21, %s1417_s12 }
  0x3e   : > { %608 = vmatpush.bf16.msra.mxu1 %v1236_v16  ;;  %681 = vmatpush.bf16.msra.mxu2 %v1236_v16 }
  0x3f   : > { %754 = vmatpush.bf16.msra.mxu3 %v1236_v16  ;;  %p1419_p4 = pnand %p1418_p1, %p1593_p3  ;;  %p1424_p9 = por %p1423_p2, %p1422_p11 }
  0x41   : > { %469 = vmatpush.bf16.msra.mxu0 %v1226_v4  ;;  %p1420_p8 = pneg %p1419_p4 }
  0x42   : > { %609 = vmatpush.bf16.msra.mxu1 %v1235_v17  ;;  %682 = vmatpush.bf16.msra.mxu2 %v1235_v17 }
  0x43   : > { %755 = vmatpush.bf16.msra.mxu3 %v1235_v17  ;;  %p1425_p10 = pnand %p1424_p9, %p1420_p8 }
  0x45   : > { %470 = vmatpush.bf16.msra.mxu0 %v1225_v5 }
  0x46   : > { %610 = vmatpush.bf16.msra.mxu1 %v1234_v18  ;;  %683 = vmatpush.bf16.msra.mxu2 %v1234_v18 }
  0x47   : > { %756 = vmatpush.bf16.msra.mxu3 %v1234_v18 }
  0x49   : > { %471 = vmatpush.bf16.msra.mxu0 %v1224_v6 }
  0x4a   : > { %611 = vmatpush.bf16.msra.mxu1 %v1233_v19  ;;  %684 = vmatpush.bf16.msra.mxu2 %v1233_v19 }
  0x4b   : > { %757 = vmatpush.bf16.msra.mxu3 %v1233_v19  ;;  %v1654_v19 = vld [vmem:[%s1806_s4] ss:$0 sm:$0xff] }
  0x4d   : > { %472 = vmatpush.bf16.msra.mxu0 %v1223_v7 }
  0x4e   : > { %612 = vmatpush.bf16.msra.mxu1 %v1232_v21  ;;  %685 = vmatpush.bf16.msra.mxu2 %v1232_v21 }
  0x4f   : > { %758 = vmatpush.bf16.msra.mxu3 %v1232_v21 }
  0x51   : > { %473 = vmatpush.bf16.msra.mxu0 %v1222_v8 }
  0x52   : > { %613 = vmatpush.bf16.msra.mxu1 %v1231_v22  ;;  %686 = vmatpush.bf16.msra.mxu2 %v1231_v22 }
  0x53   : > { %759 = vmatpush.bf16.msra.mxu3 %v1231_v22 }
  0x54   : > { %474 = vmatmul.bf16.vlgmr.msra.gmra.mxu0 %v1214_v9 }
  0x56   : > { %614 = vmatpush.bf16.msra.mxu1 %v1230_v23  ;;  %687 = vmatpush.bf16.msra.mxu2 %v1230_v23 }
  0x57   : > { %760 = vmatpush.bf16.msra.mxu3 %v1230_v23 }
  0x64   : > { %479 = vmatmul.bf16.gmra.mxu0 %v1215_v10 }
  0x74   : > { %484 = vmatmul.bf16.gmra.mxu0 %v1216_v11 }
  0x84   : > { %489 = vmatmul.bf16.gmra.mxu0 %v1217_v12 }
  0x94   : > { %494 = vmatmul.bf16.gmra.mxu0 %v1218_v13 }
  0xa4   : > { %499 = vmatmul.bf16.gmra.mxu0 %v1219_v15 }
  0xb4   : > { %504 = vmatmul.bf16.gmra.mxu0 %v1220_v20 }
  0xc4   : > { %509 = vmatmul.bf16.gmra.mxu0 %v1221_v24 }
  0xd1   : > { %v475_v25 = vpop.f32.mrf.mxu0 }
  0xd2   : > { %v476_v27 = vadd.f32 %v1309_v26, %v475_v25 }
  0xd4   : > { %v515_v30 = vmax.f32 %v476_v27, 0.0 }
  0xd9   : > { %v477_v28 = vpop.f32.mrf.mxu0 }
  0xda   : > { %v478_v29 = vadd.f32 %v1309_v26, %v477_v28 }
  0xdc   : > { %v516_v31 = vmax.f32 %v478_v29, 0.0 }
  0xde   : > { %v531_v32 = vpack.c.bf16 %v516_v31, %v515_v30 }
  0xe0   : > { %615 = vmatmul.bf16.vlgmr.msra.gmra.mxu1 %v531_v32 }
  0xe1   : > { %v480_v33 = vpop.f32.mrf.mxu0 }
  0xe2   : > { %v481_v34 = vadd.f32 %v1309_v26, %v480_v33 }
  0xe4   : > { %v517_v37 = vmax.f32 %v481_v34, 0.0 }
  0xe9   : > { %v482_v35 = vpop.f32.mrf.mxu0 }
  0xea   : > { %v483_v36 = vadd.f32 %v1309_v26, %v482_v35 }
  0xec   : > { %v518_v38 = vmax.f32 %v483_v36, 0.0 }
  0xee   : > { %v532_v39 = vpack.c.bf16 %v518_v38, %v517_v37 }
  0xf0   : > { %620 = vmatmul.bf16.gmra.mxu1 %v532_v39 }
  0xf1   : > { %v485_v40 = vpop.f32.mrf.mxu0 }
  0xf2   : > { %v486_v41 = vadd.f32 %v1309_v26, %v485_v40 }
  0xf4   : > { %v519_v44 = vmax.f32 %v486_v41, 0.0 }
  0xf9   : > { %v487_v42 = vpop.f32.mrf.mxu0 }
  0xfa   : > { %v488_v43 = vadd.f32 %v1309_v26, %v487_v42 }
  0xfc   : > { %v520_v45 = vmax.f32 %v488_v43, 0.0 }
  0xfe   : > { %v533_v46 = vpack.c.bf16 %v520_v45, %v519_v44 }
 0x100   : > { %625 = vmatmul.bf16.gmra.mxu1 %v533_v46 }
 0x101   : > { %v490_v47 = vpop.f32.mrf.mxu0 }
 0x102   : > { %v491_v48 = vadd.f32 %v1309_v26, %v490_v47 }
 0x104   : > { %v521_v51 = vmax.f32 %v491_v48, 0.0 }
 0x109   : > { %v492_v49 = vpop.f32.mrf.mxu0 }
 0x10a   : > { %v493_v50 = vadd.f32 %v1309_v26, %v492_v49 }
 0x10c   : > { %v522_v52 = vmax.f32 %v493_v50, 0.0 }
 0x10e   : > { %v534_v53 = vpack.c.bf16 %v522_v52, %v521_v51 }
 0x110   : > { %630 = vmatmul.bf16.gmra.mxu1 %v534_v53 }
 0x111   : > { %v495_v54 = vpop.f32.mrf.mxu0 }
 0x112   : > { %v496_v55 = vadd.f32 %v1309_v26, %v495_v54 }
 0x114   : > { %v523_v58 = vmax.f32 %v496_v55, 0.0 }
 0x119   : > { %v497_v56 = vpop.f32.mrf.mxu0 }
 0x11a   : > { %v498_v57 = vadd.f32 %v1309_v26, %v497_v56 }
 0x11c   : > { %v524_v59 = vmax.f32 %v498_v57, 0.0 }
 0x11e   : > { %v535_v60 = vpack.c.bf16 %v524_v59, %v523_v58 }
 0x120   : > { %635 = vmatmul.bf16.gmra.mxu1 %v535_v60 }
 0x121   : > { %v500_v61 = vpop.f32.mrf.mxu0 }
 0x122   : > { %v501_v62 = vadd.f32 %v1309_v26, %v500_v61 }
 0x124   : > { %v525_v1 = vmax.f32 %v501_v62, 0.0 }
 0x129   : > { %v502_v63 = vpop.f32.mrf.mxu0 }
 0x12a   : > { %v503_v0 = vadd.f32 %v1309_v26, %v502_v63 }
 0x12c   : > { %v526_v2 = vmax.f32 %v503_v0, 0.0 }
 0x12e   : > { %v536_v3 = vpack.c.bf16 %v526_v2, %v525_v1 }
 0x130   : > { %640 = vmatmul.bf16.gmra.mxu1 %v536_v3 }
 0x131   : > { %v505_v4 = vpop.f32.mrf.mxu0 }
 0x132   : > { %v506_v5 = vadd.f32 %v1309_v26, %v505_v4 }
 0x134   : > { %v527_v8 = vmax.f32 %v506_v5, 0.0 }
 0x139   : > { %v507_v6 = vpop.f32.mrf.mxu0 }
 0x13a   : > { %v508_v7 = vadd.f32 %v1309_v26, %v507_v6 }
 0x13c   : > { %v528_v9 = vmax.f32 %v508_v7, 0.0 }
 0x13e   : > { %v537_v10 = vpack.c.bf16 %v528_v9, %v527_v8 }
 0x140   : > { %645 = vmatmul.bf16.gmra.mxu1 %v537_v10 }
 0x141   : > { %v510_v11 = vpop.f32.mrf.mxu0 }
 0x142   : > { %v511_v12 = vadd.f32 %v1309_v26, %v510_v11 }
 0x144   : > { %v529_v15 = vmax.f32 %v511_v12, 0.0 }
 0x149   : > { %v512_v13 = vpop.f32.mrf.mxu0 }
 0x14a   : > { %v513_v14 = vadd.f32 %v1309_v26, %v512_v13 }
 0x14c   : > { %v530_v16 = vmax.f32 %v513_v14, 0.0 }
 0x14e   : > { %v538_v17 = vpack.c.bf16 %v530_v16, %v529_v15 }
 0x150   : > { %650 = vmatmul.bf16.gmra.mxu1 %v538_v17 }
 0x15d   : > { %v616_v18 = vpop.f32.mrf.mxu1 }
 0x15e   : > { %v617_v20 = vadd.f32 %v1654_v19, %v616_v18 }
 0x160   : > { %v656_v23 = vmax.f32 %v617_v20, 0.0 }
 0x165   : > { %v618_v21 = vpop.f32.mrf.mxu1 }
 0x166   : > { %v619_v22 = vadd.f32 %v1654_v19, %v618_v21 }
 0x168   : > { %v657_v24 = vmax.f32 %v619_v22, 0.0 }
 0x16a   : > { %v672_v25 = vpack.c.bf16 %v657_v24, %v656_v23 }
 0x16c   : > { %688 = vmatmul.bf16.vlgmr.msra.gmra.mxu2 %v672_v25 }
 0x16d   : > { %v621_v26 = vpop.f32.mrf.mxu1 }
 0x16e   : > { %v622_v27 = vadd.f32 %v1654_v19, %v621_v26 }
 0x170   : > { %v658_v30 = vmax.f32 %v622_v27, 0.0 }
 0x175   : > { %v623_v28 = vpop.f32.mrf.mxu1 }
 0x176   : > { %v624_v29 = vadd.f32 %v1654_v19, %v623_v28 }
 0x178   : > { %v659_v31 = vmax.f32 %v624_v29, 0.0 }
 0x17a   : > { %v673_v32 = vpack.c.bf16 %v659_v31, %v658_v30 }
 0x17c   : > { %693 = vmatmul.bf16.gmra.mxu2 %v673_v32 }
 0x17d   : > { %v626_v33 = vpop.f32.mrf.mxu1 }
 0x17e   : > { %v627_v34 = vadd.f32 %v1654_v19, %v626_v33 }
 0x180   : > { %v660_v37 = vmax.f32 %v627_v34, 0.0 }
 0x185   : > { %v628_v35 = vpop.f32.mrf.mxu1 }
 0x186   : > { %v629_v36 = vadd.f32 %v1654_v19, %v628_v35 }
 0x188   : > { %v661_v38 = vmax.f32 %v629_v36, 0.0 }
 0x18a   : > { %v674_v39 = vpack.c.bf16 %v661_v38, %v660_v37 }
 0x18c   : > { %698 = vmatmul.bf16.gmra.mxu2 %v674_v39 }
 0x18d   : > { %v631_v40 = vpop.f32.mrf.mxu1 }
 0x18e   : > { %v632_v41 = vadd.f32 %v1654_v19, %v631_v40 }
 0x190   : > { %v662_v44 = vmax.f32 %v632_v41, 0.0 }
 0x195   : > { %v633_v42 = vpop.f32.mrf.mxu1 }
 0x196   : > { %v634_v43 = vadd.f32 %v1654_v19, %v633_v42 }
 0x198   : > { %v663_v45 = vmax.f32 %v634_v43, 0.0 }
 0x19a   : > { %v675_v46 = vpack.c.bf16 %v663_v45, %v662_v44 }
 0x19c   : > { %703 = vmatmul.bf16.gmra.mxu2 %v675_v46 }
 0x19d   : > { %v636_v47 = vpop.f32.mrf.mxu1 }
 0x19e   : > { %v637_v48 = vadd.f32 %v1654_v19, %v636_v47 }
 0x1a0   : > { %v664_v51 = vmax.f32 %v637_v48, 0.0  ;;  %v1477_v48 = vmov 0  }
 0x1a1   : > { %1308 = vset.pattern.permute.xlu0 %v1477_v48 }
 0x1a5   : > { %v638_v49 = vpop.f32.mrf.mxu1 }
 0x1a6   : > { %v639_v50 = vadd.f32 %v1654_v19, %v638_v49  ;;  %v901_v49 = vld [vmem:[#allocation2] sm:$0x1] }
 0x1a7   : > { %904 = vperm.xlu0 %1308, %v901_v49  }
 0x1a8   : > { %v665_v52 = vmax.f32 %v639_v50, 0.0 }
 0x1aa   : > { %v676_v53 = vpack.c.bf16 %v665_v52, %v664_v51 }
 0x1ac   : > { %708 = vmatmul.bf16.gmra.mxu2 %v676_v53 }
 0x1ad   : > { %v641_v54 = vpop.f32.mrf.mxu1 }
 0x1ae   : > { %v642_v55 = vadd.f32 %v1654_v19, %v641_v54 }
 0x1b0   : > { %v666_v58 = vmax.f32 %v642_v55, 0.0 }
 0x1b5   : > { %v643_v56 = vpop.f32.mrf.mxu1 }
 0x1b6   : > { %v644_v57 = vadd.f32 %v1654_v19, %v643_v56 }
 0x1b8   : > { %v667_v59 = vmax.f32 %v644_v57, 0.0 }
 0x1ba   : > { %v677_v60 = vpack.c.bf16 %v667_v59, %v666_v58 }
 0x1bc   : > { %713 = vmatmul.bf16.gmra.mxu2 %v677_v60 }
 0x1bd   : > { %v646_v61 = vpop.f32.mrf.mxu1 }
 0x1be   : > { %v647_v62 = vadd.f32 %v1654_v19, %v646_v61 }
 0x1c0   : > { %v668_v1 = vmax.f32 %v647_v62, 0.0 }
 0x1c5   : > { %v648_v63 = vpop.f32.mrf.mxu1 }
 0x1c6   : > { %v649_v0 = vadd.f32 %v1654_v19, %v648_v63 }
 0x1c8   : > { %v669_v2 = vmax.f32 %v649_v0, 0.0 }
 0x1ca   : > { %v678_v3 = vpack.c.bf16 %v669_v2, %v668_v1 }
 0x1cc   : > { %718 = vmatmul.bf16.gmra.mxu2 %v678_v3 }
 0x1cd   : > { %v651_v4 = vpop.f32.mrf.mxu1 }
 0x1ce   : > { %v652_v5 = vadd.f32 %v1654_v19, %v651_v4 }
 0x1d0   : > { %v670_v8 = vmax.f32 %v652_v5, 0.0 }
 0x1d5   : > { %v653_v6 = vpop.f32.mrf.mxu1 }
 0x1d6   : > { %v654_v7 = vadd.f32 %v1654_v19, %v653_v6  ;;  %v850_v6 = vld [vmem:[%s1807_s5] sm:$0x1] }
 0x1d8   : > { %v671_v9 = vmax.f32 %v654_v7, 0.0 }
 0x1da   : > { %v679_v10 = vpack.c.bf16 %v671_v9, %v670_v8  ;;  %v851_v9 = vunpack.c.l.bf16 %v850_v6 }
 0x1dc   : > { %723 = vmatmul.bf16.gmra.mxu2 %v679_v10 }
 0x1ef   : > { %v689_v11 = vpop.f32.mrf.mxu2 }
 0x1f0   : > { %v690_v12 = vadd.f32 %v1654_v19, %v689_v11 }
 0x1f2   : > { %v729_v15 = vmax.f32 %v690_v12, 0.0  ;;  %v1692_v12 = vperm.slane %v851_v9, 0 }
 0x1f7   : > { %v691_v13 = vpop.f32.mrf.mxu2 }
 0x1f8   : > { %v692_v14 = vadd.f32 %v1654_v19, %v691_v13 }
 0x1fa   : > { %v730_v16 = vmax.f32 %v692_v14, 0.0 }
 0x1fc   : > { %v745_v17 = vpack.c.bf16 %v730_v16, %v729_v15 }
 0x1fe   : > { %761 = vmatmul.bf16.vlgmr.msra.gmra.mxu3 %v745_v17 }
 0x1ff   : > { %v694_v18 = vpop.f32.mrf.mxu2 }
 0x200   : > { %v695_v20 = vadd.f32 %v1654_v19, %v694_v18 }
 0x202   : > { %v731_v23 = vmax.f32 %v695_v20, 0.0 }
 0x207   : > { %v696_v21 = vpop.f32.mrf.mxu2 }
 0x208   : > { %v697_v22 = vadd.f32 %v1654_v19, %v696_v21 }
 0x20a   : > { %v732_v24 = vmax.f32 %v697_v22, 0.0 }
 0x20c   : > { %v746_v25 = vpack.c.bf16 %v732_v24, %v731_v23 }
 0x20e   : > { %766 = vmatmul.bf16.gmra.mxu3 %v746_v25 }
 0x20f   : > { %v699_v26 = vpop.f32.mrf.mxu2 }
 0x210   : > { %v700_v27 = vadd.f32 %v1654_v19, %v699_v26 }
 0x212   : > { %v733_v30 = vmax.f32 %v700_v27, 0.0 }
 0x217   : > { %v701_v28 = vpop.f32.mrf.mxu2 }
 0x218   : > { %v702_v29 = vadd.f32 %v1654_v19, %v701_v28 }
 0x21a   : > { %v734_v31 = vmax.f32 %v702_v29, 0.0 }
 0x21c   : > { %v747_v32 = vpack.c.bf16 %v734_v31, %v733_v30 }
 0x21e   : > { %771 = vmatmul.bf16.gmra.mxu3 %v747_v32 }
 0x21f   : > { %v704_v33 = vpop.f32.mrf.mxu2 }
 0x220   : > { %v705_v34 = vadd.f32 %v1654_v19, %v704_v33 }
 0x222   : > { %v735_v37 = vmax.f32 %v705_v34, 0.0 }
 0x227   : > { %v706_v35 = vpop.f32.mrf.mxu2 }
 0x228   : > { %v707_v36 = vadd.f32 %v1654_v19, %v706_v35 }
 0x22a   : > { %v736_v38 = vmax.f32 %v707_v36, 0.0 }
 0x22c   : > { %v748_v39 = vpack.c.bf16 %v736_v38, %v735_v37 }
 0x22e   : > { %776 = vmatmul.bf16.gmra.mxu3 %v748_v39 }
 0x22f   : > { %v709_v40 = vpop.f32.mrf.mxu2 }
 0x230   : > { %v710_v41 = vadd.f32 %v1654_v19, %v709_v40 }
 0x232   : > { %v737_v44 = vmax.f32 %v710_v41, 0.0 }
 0x237   : > { %v711_v42 = vpop.f32.mrf.mxu2 }
 0x238   : > { %v712_v43 = vadd.f32 %v1654_v19, %v711_v42 }
 0x23a   : > { %v738_v45 = vmax.f32 %v712_v43, 0.0 }
 0x23c   : > { %v749_v46 = vpack.c.bf16 %v738_v45, %v737_v44 }
 0x23e   : > { %781 = vmatmul.bf16.gmra.mxu3 %v749_v46 }
 0x23f   : > { %v714_v47 = vpop.f32.mrf.mxu2 }
 0x240   : > { %v715_v50 = vadd.f32 %v1654_v19, %v714_v47 }
 0x242   : > { %v739_v53 = vmax.f32 %v715_v50, 0.0 }
 0x247   : > { %v716_v51 = vpop.f32.mrf.mxu2 }
 0x248   : > { %v717_v52 = vadd.f32 %v1654_v19, %v716_v51 }
 0x24a   : > { %v740_v54 = vmax.f32 %v717_v52, 0.0 }
 0x24c   : > { %v750_v55 = vpack.c.bf16 %v740_v54, %v739_v53 }
 0x24e   : > { %786 = vmatmul.bf16.gmra.mxu3 %v750_v55 }
 0x24f   : > { %v719_v56 = vpop.f32.mrf.mxu2 }
 0x250   : > { %v720_v57 = vadd.f32 %v1654_v19, %v719_v56 }
 0x252   : > { %v741_v60 = vmax.f32 %v720_v57, 0.0 }
 0x257   : > { %v721_v58 = vpop.f32.mrf.mxu2 }
 0x258   : > { %v722_v59 = vadd.f32 %v1654_v19, %v721_v58 }
 0x25a   : > { %v742_v61 = vmax.f32 %v722_v59, 0.0 }
 0x25c   : > { %v751_v62 = vpack.c.bf16 %v742_v61, %v741_v60 }
 0x25e   : > { %791 = vmatmul.bf16.gmra.mxu3 %v751_v62 }
 0x25f   : > { %v724_v63 = vpop.f32.mrf.mxu2 }
 0x260   : > { %v725_v0 = vadd.f32 %v1654_v19, %v724_v63 }
 0x262   : > { %v743_v3 = vmax.f32 %v725_v0, 0.0 }
 0x267   : > { %v726_v1 = vpop.f32.mrf.mxu2 }
 0x268   : > { %v727_v2 = vadd.f32 %v1654_v19, %v726_v1 }
 0x26a   : > { %v744_v4 = vmax.f32 %v727_v2, 0.0 }
 0x26c   : > { %v752_v5 = vpack.c.bf16 %v744_v4, %v743_v3 }
 0x26e   : > { %796 = vmatmul.bf16.gmra.mxu3 %v752_v5 }
 0x281   : > { %v762_v7 = vpop.f32.mrf.mxu3 }
 0x282   : > { %v763_v8 = vadd.f32 %v1654_v19, %v762_v7 }
 0x284   : > { %v802_v10 = vmax.f32 %v763_v8, 0.0 }
 0x286   : > { %v818_v11 = vpack.c.bf16 %v802_v10, %v802_v10 }
 0x288   : > { %v834_v13 = vunpack.c.l.bf16 %v818_v11 }
 0x289   : > { %v764_v14 = vpop.f32.mrf.mxu3 }
 0x28a   : > { %v765_v15 = vadd.f32 %v1654_v19, %v764_v14  ;;  %v853_v16 = vmul.f32 %v1692_v12, %v834_v13 }
 0x28c   : > { %v803_v17 = vmax.f32 %v765_v15, 0.0  ;;  %869 = vadd.xlane.f32.xlu0 %v853_v16 }
 0x28e   : > { %v819_v18 = vpack.c.bf16 %v803_v17, %v803_v17 }
 0x290   : > { %v835_v20 = vunpack.c.l.bf16 %v819_v18 }
 0x291   : > { %v767_v21 = vpop.f32.mrf.mxu3 }
 0x292   : > { %v768_v22 = vadd.f32 %v1654_v19, %v767_v21  ;;  %v854_v23 = vmul.f32 %v1692_v12, %v835_v20 }
 0x294   : > { %v804_v24 = vmax.f32 %v768_v22, 0.0  ;;  %871 = vadd.xlane.f32.xlu1 %v854_v23 }
 0x296   : > { %v820_v25 = vpack.c.bf16 %v804_v24, %v804_v24 }
 0x298   : > { %v836_v26 = vunpack.c.l.bf16 %v820_v25 }
 0x299   : > { %v769_v27 = vpop.f32.mrf.mxu3 }
 0x29a   : > { %v770_v28 = vadd.f32 %v1654_v19, %v769_v27  ;;  %v855_v29 = vmul.f32 %v1692_v12, %v836_v26 }
 0x29c   : > { %v805_v30 = vmax.f32 %v770_v28, 0.0  ;;  %873 = vadd.xlane.f32.xlu1 %v855_v29 }
 0x29e   : > { %v821_v31 = vpack.c.bf16 %v805_v30, %v805_v30 }
 0x2a0   : > { %v837_v32 = vunpack.c.l.bf16 %v821_v31 }
 0x2a1   : > { %v772_v33 = vpop.f32.mrf.mxu3 }
 0x2a2   : > { %v773_v34 = vadd.f32 %v1654_v19, %v772_v33  ;;  %v856_v35 = vmul.f32 %v1692_v12, %v837_v32 }
 0x2a4   : > { %v806_v36 = vmax.f32 %v773_v34, 0.0  ;;  %875 = vadd.xlane.f32.xlu2 %v856_v35 }
 0x2a6   : > { %v822_v37 = vpack.c.bf16 %v806_v36, %v806_v36 }
 0x2a8   : > { %v838_v38 = vunpack.c.l.bf16 %v822_v37 }
 0x2a9   : > { %v774_v39 = vpop.f32.mrf.mxu3 }
 0x2aa   : > { %v775_v40 = vadd.f32 %v1654_v19, %v774_v39  ;;  %v857_v41 = vmul.f32 %v1692_v12, %v838_v38 }
 0x2ac   : > { %v807_v42 = vmax.f32 %v775_v40, 0.0  ;;  %877 = vadd.xlane.f32.xlu2 %v857_v41 }
 0x2ae   : > { %v823_v43 = vpack.c.bf16 %v807_v42, %v807_v42 }
 0x2b0   : > { %v839_v44 = vunpack.c.l.bf16 %v823_v43 }
 0x2b1   : > { %v777_v45 = vpop.f32.mrf.mxu3 }
 0x2b2   : > { %v778_v46 = vadd.f32 %v1654_v19, %v777_v45  ;;  %v858_v47 = vmul.f32 %v1692_v12, %v839_v44 }
 0x2b4   : > { %v808_v48 = vmax.f32 %v778_v46, 0.0  ;;  %879 = vadd.xlane.f32.xlu1 %v858_v47 }
 0x2b6   : > { %v824_v49 = vpack.c.bf16 %v808_v48, %v808_v48 }
 0x2b8   : > { %v840_v50 = vunpack.c.l.bf16 %v824_v49 }
 0x2b9   : > { %v779_v51 = vpop.f32.mrf.mxu3 }
 0x2ba   : > { %v780_v52 = vadd.f32 %v1654_v19, %v779_v51  ;;  %v859_v53 = vmul.f32 %v1692_v12, %v840_v50  ;;  %v905_v51 = vpop.permute.xlu0 %904 }
 0x2bc   : > { %v809_v54 = vmax.f32 %v780_v52, 0.0  ;;  %881 = vadd.xlane.f32.xlu2 %v859_v53  ;;  %v940_v53 = vlaneseq }
 0x2be   : > { %v825_v55 = vpack.c.bf16 %v809_v54, %v809_v54 }
 0x2c0   : > { %v841_v56 = vunpack.c.l.bf16 %v825_v55  ;;  %v1725_v55 = vperm.slane %v905_v51, 0 }
 0x2c1   : > { %v782_v57 = vpop.f32.mrf.mxu3 }
 0x2c2   : > { %v783_v58 = vadd.f32 %v1654_v19, %v782_v57  ;;  %v860_v59 = vmul.f32 %v1692_v12, %v841_v56  ;;  %v1727_v56 = vand.u32 127, %v940_v53 }
 0x2c4   : > { %v810_v60 = vmax.f32 %v783_v58, 0.0  ;;  %883 = vadd.xlane.f32.xlu1 %v860_v59  ;;  %v999_v51 = vadd.s32 4294967176, %v1727_v56 }
 0x2c6   : > { %v826_v61 = vpack.c.bf16 %v810_v60, %v810_v60  ;;  %v947_v60 = vadd.s32 4294967280, %v1727_v56 }
 0x2c8   : > { %v842_v62 = vunpack.c.l.bf16 %v826_v61 }
 0x2c9   : > { %v784_v63 = vpop.f32.mrf.mxu3 }
 0x2ca   : > { %v785_v0 = vadd.f32 %v1654_v19, %v784_v63  ;;  %v861_v1 = vmul.f32 %v1692_v12, %v842_v62  ;;  %v951_v62 = vadd.s32 4294967272, %v1727_v56 }
 0x2cc   : > { %v811_v2 = vmax.f32 %v785_v0, 0.0  ;;  %885 = vadd.xlane.f32.xlu2 %v861_v1 }
 0x2ce   : > { %v827_v3 = vpack.c.bf16 %v811_v2, %v811_v2  ;;  %v955_v2 = vadd.s32 4294967264, %v1727_v56 }
 0x2d0   : > { %v843_v4 = vunpack.c.l.bf16 %v827_v3 }
 0x2d1   : > { %v787_v5 = vpop.f32.mrf.mxu3 }
 0x2d2   : > { %v788_v6 = vadd.f32 %v1654_v19, %v787_v5  ;;  %v862_v7 = vmul.f32 %v1692_v12, %v843_v4 }
 0x2d4   : > { %v812_v8 = vmax.f32 %v788_v6, 0.0  ;;  %887 = vadd.xlane.f32.xlu1 %v862_v7 }
 0x2d6   : > { %v828_v9 = vpack.c.bf16 %v812_v8, %v812_v8  ;;  %v959_v8 = vadd.s32 4294967256, %v1727_v56 }
 0x2d8   : > { %v844_v10 = vunpack.c.l.bf16 %v828_v9 }
 0x2d9   : > { %v789_v11 = vpop.f32.mrf.mxu3 }
 0x2da   : > { %v790_v13 = vadd.f32 %v1654_v19, %v789_v11  ;;  %v863_v14 = vmul.f32 %v1692_v12, %v844_v10  ;;  %v963_v11 = vadd.s32 4294967248, %v1727_v56 }
 0x2dc   : > { %v813_v15 = vmax.f32 %v790_v13, 0.0  ;;  %889 = vadd.xlane.f32.xlu2 %v863_v14 }
 0x2de   : > { %v829_v16 = vpack.c.bf16 %v813_v15, %v813_v15  ;;  %v967_v15 = vadd.s32 4294967240, %v1727_v56 }
 0x2e0   : > { %v845_v17 = vunpack.c.l.bf16 %v829_v16 }
 0x2e1   : > { %v792_v18 = vpop.f32.mrf.mxu3 }
 0x2e2   : > { %v793_v20 = vadd.f32 %v1654_v19, %v792_v18  ;;  %v864_v21 = vmul.f32 %v1692_v12, %v845_v17  ;;  %v971_v18 = vadd.s32 4294967232, %v1727_v56 }
 0x2e4   : > { %v814_v22 = vmax.f32 %v793_v20, 0.0  ;;  %891 = vadd.xlane.f32.xlu1 %v864_v21 }
 0x2e6   : > { %v830_v23 = vpack.c.bf16 %v814_v22, %v814_v22 }
 0x2e8   : > { %v846_v24 = vunpack.c.l.bf16 %v830_v23  ;;  %v975_v23 = vadd.s32 4294967224, %v1727_v56 }
 0x2e9   : > { %v794_v25 = vpop.f32.mrf.mxu3 }
 0x2ea   : > { %v795_v26 = vadd.f32 %v1654_v19, %v794_v25  ;;  %v865_v27 = vmul.f32 %v1692_v12, %v846_v24 }
 0x2ec   : > { %v815_v28 = vmax.f32 %v795_v26, 0.0  ;;  %893 = vadd.xlane.f32.xlu2 %v865_v27  ;;  %v979_v26 = vadd.s32 4294967216, %v1727_v56 }
 0x2ee   : > { %v831_v29 = vpack.c.bf16 %v815_v28, %v815_v28 }
 0x2f0   : > { %v847_v30 = vunpack.c.l.bf16 %v831_v29 }
 0x2f1   : > { %v797_v31 = vpop.f32.mrf.mxu3 }
 0x2f2   : > { %v798_v32 = vadd.f32 %v1654_v19, %v797_v31  ;;  %v866_v33 = vmul.f32 %v1692_v12, %v847_v30  ;;  %v983_v31 = vadd.s32 4294967208, %v1727_v56 }
 0x2f4   : > { %v816_v34 = vmax.f32 %v798_v32, 0.0  ;;  %895 = vadd.xlane.f32.xlu1 %v866_v33 }
 0x2f6   : > { %v832_v35 = vpack.c.bf16 %v816_v34, %v816_v34 }
 0x2f8   : > { %v848_v36 = vunpack.c.l.bf16 %v832_v35  ;;  %v987_v35 = vadd.s32 4294967200, %v1727_v56 }
 0x2f9   : > { %v799_v37 = vpop.f32.mrf.mxu3 }
 0x2fa   : > { %v800_v38 = vadd.f32 %v1654_v19, %v799_v37  ;;  %v867_v39 = vmul.f32 %v1692_v12, %v848_v36 }
 0x2fc   : > { %v817_v40 = vmax.f32 %v800_v38, 0.0  ;;  %897 = vadd.xlane.f32.xlu2 %v867_v39  ;;  %v991_v39 = vadd.s32 4294967192, %v1727_v56 }
 0x2fe   : > { %v833_v41 = vpack.c.bf16 %v817_v40, %v817_v40 }
 0x2ff   : > { %v870_v57 = vpop.xlane.xlu0 %869 }
 0x300   : > { %v849_v42 = vunpack.c.l.bf16 %v833_v41  ;;  %v908_v59 = vadd.f32 %v1725_v55, %v870_v57 }
 0x302   : > { %v868_v43 = vmul.f32 %v1692_v12, %v849_v42  ;;  %v943_v12 = vadd.s32 4294967288, %v1727_v56  ;;  %v942_v5 = vperm.slane %v908_v59, %v1727_v56 }
 0x304   : > { %899 = vadd.xlane.f32.xlu0 %v868_v43  ;;  %v995_v43 = vadd.s32 4294967184, %v1727_v56 }
 0x307   : > { %v872_v44 = vpop.xlane.xlu1 %871 }
 0x308   : > { %v909_v58 = vadd.f32 %v1725_v55, %v872_v44 }
 0x30a   : > { %v944_v0 = vperm.slane %v909_v58, %v943_v12 }
 0x30c   : > { %v946_v10 = vsel %vm945_vm0, %v944_v0, %v942_v5 }
 0x30f   : > { %v874_v46 = vpop.xlane.xlu1 %873 }
 0x310   : > { %v910_v61 = vadd.f32 %v1725_v55, %v874_v46 }
 0x312   : > { %v948_v6 = vperm.slane %v910_v61, %v947_v60 }
 0x314   : > { %v950_v17 = vsel %vm949_vm1, %v948_v6, %v946_v10 }
 0x317   : > { %v876_v45 = vpop.xlane.xlu2 %875 }
 0x318   : > { %v911_v63 = vadd.f32 %v1725_v55, %v876_v45 }
 0x31a   : > { %v952_v7 = vperm.slane %v911_v63, %v951_v62 }
 0x31c   : > { %v954_v21 = vsel %vm953_vm2, %v952_v7, %v950_v17 }
 0x31f   : > { %v878_v47 = vpop.xlane.xlu2 %877 }
 0x320   : > { %v912_v3 = vadd.f32 %v1725_v55, %v878_v47 }
 0x322   : > { %v956_v14 = vperm.slane %v912_v3, %v955_v2 }
 0x324   : > { %v958_v29 = vsel %vm957_vm3, %v956_v14, %v954_v21 }
 0x327   : > { %v880_v48 = vpop.xlane.xlu1 %879 }
 0x328   : > { %v913_v9 = vadd.f32 %v1725_v55, %v880_v48 }
 0x32a   : > { %v960_v22 = vperm.slane %v913_v9, %v959_v8 }
 0x32c   : > { %v962_v37 = vsel %vm961_vm4, %v960_v22, %v958_v29 }
 0x32f   : > { %v882_v49 = vpop.xlane.xlu2 %881 }
 0x330   : > { %v914_v13 = vadd.f32 %v1725_v55, %v882_v49 }
 0x332   : > { %v964_v25 = vperm.slane %v914_v13, %v963_v11 }
 0x334   : > { %v966_v41 = vsel %vm965_vm5, %v964_v25, %v962_v37 }
 0x337   : > { %v884_v50 = vpop.xlane.xlu1 %883 }
 0x338   : > { %v915_v16 = vadd.f32 %v1725_v55, %v884_v50 }
 0x33a   : > { %v968_v30 = vperm.slane %v915_v16, %v967_v15 }
 0x33c   : > { %v970_v45 = vsel %vm969_vm6, %v968_v30, %v966_v41 }
 0x33f   : > { %v886_v52 = vpop.xlane.xlu2 %885 }
 0x340   : > { %v916_v20 = vadd.f32 %v1725_v55, %v886_v52 }
 0x342   : > { %v972_v34 = vperm.slane %v916_v20, %v971_v18 }
 0x344   : > { %v974_v47 = vsel %vm973_vm7, %v972_v34, %v970_v45 }
 0x347   : > { %v888_v19 = vpop.xlane.xlu1 %887 }
 0x348   : > { %v917_v24 = vadd.f32 %v1725_v55, %v888_v19 }
 0x34a   : > { %v976_v38 = vperm.slane %v917_v24, %v975_v23 }
 0x34c   : > { %v978_v49 = vsel %vm977_vm8, %v976_v38, %v974_v47 }
 0x34f   : > { %v890_v54 = vpop.xlane.xlu2 %889 }
 0x350   : > { %v918_v27 = vadd.f32 %v1725_v55, %v890_v54 }
 0x352   : > { %v980_v42 = vperm.slane %v918_v27, %v979_v26 }
 0x354   : > { %v982_v52 = vsel %vm981_vm9, %v980_v42, %v978_v49 }
 0x357   : > { %v892_v1 = vpop.xlane.xlu1 %891 }
 0x358   : > { %v919_v32 = vadd.f32 %v1725_v55, %v892_v1 }
 0x35a   : > { %v984_v46 = vperm.slane %v919_v32, %v983_v31 }
 0x35c   : > { %v986_v54 = vsel %vm985_vm10, %v984_v46, %v982_v52 }
 0x35f   : > { %v894_v4 = vpop.xlane.xlu2 %893 }
 0x360   : > { %v920_v36 = vadd.f32 %v1725_v55, %v894_v4 }
 0x362   : > { %v988_v48 = vperm.slane %v920_v36, %v987_v35 }
 0x364   : > { %v990_v12 = vsel %vm989_vm11, %v988_v48, %v986_v54 }
 0x367   : > { %v896_v28 = vpop.xlane.xlu1 %895 }
 0x368   : > { %v921_v40 = vadd.f32 %v1725_v55, %v896_v28 }
 0x36a   : > { %v992_v50 = vperm.slane %v921_v40, %v991_v39 }
 0x36c   : > { %v994_v58 = vsel %vm993_vm12, %v992_v50, %v990_v12 }
 0x36f   : > { %v898_v33 = vpop.xlane.xlu2 %897 }
 0x370   : > { %v922_v44 = vadd.f32 %v1725_v55, %v898_v33 }
 0x372   : > { %v996_v53 = vperm.slane %v922_v44, %v995_v43 }
 0x374   : > { %v998_v60 = vsel %vm997_vm13, %v996_v53, %v994_v58 }
 0x377   : > { %v900_v19 = vpop.xlane.xlu0 %899 }
 0x378   : > { %v923_v57 = vadd.f32 %v1725_v55, %v900_v19 }
 0x37a   : > { %v1000_v59 = vperm.slane %v923_v57, %v999_v51 }
 0x37c   : > { %v1002_v56 = vsel %vm1001_vm14, %v1000_v59, %v998_v60 }
 0x37d   : > { %1004 = vst [vmem:[%s332_s11] sm:$0x1] %v1002_v56 }
 0x37e   : > { %1428 = shalt.err (!%p1425_p10)
}
 0x37f   : > { %1248 = dma.vmem_to_hbm [thread:$0]  (%p1593_p3), %s1017_s18, 16, %s1019_s19, %s1006_s6  }
 0x380 PF: > { %s1030_s14 = sand.u32 1, %s1459_s26   ;;  %p1819_p12 = scmp.ge.s32.totalorder %s1471_s29, 2 }
 0x381   : > { %s1031_s24 = scalar_lea.sflag [#allocation5], %s1030_s14 }
 0x382   : > { %p1262_p13 = pnand %p1819_p12, %p1556_p6 }
 0x384   : > { %p1263_p0 = pneg %p1262_p13 }
 0x386   : > { %1454 = dma.done.wait (%p1263_p0), %s1031_s24, 16  }
 0x387   : > { %1456 = vsyncadd (%p1263_p0), %s1031_s24, 4294967280  ;;  %p23_p5 = scmp.ge.s32.totalorder %s1583_s23, 4   ;;  %s1820_s26 = smov %s1463_s27 }
 0x388   : > { %s1821_s27 = smov %s1467_s28  ;;  %s1822_s28 = smov %s1599_s10 }
 0x389   : > { %s1823_s29 = smov %s1583_s23  ;;  %25 = sbr.rel (!%p23_p5) target bundleno = 9 (0x9), region = 101 }
 0x38e   :  { %1036 = vsyncpa [#allocation4], 1 }
 0x38f   :  { %1038 = vsyncpa [#allocation4 + $0x1], 1 }
 0x390   :  { %1039 = vsyncpa [#allocation7], 1 }
 0x391   :  { %1040 = vsyncpa [#allocation5], 1 }
 0x392   :  { %1042 = vsyncpa [#allocation5 + $0x1], 1 }

</bundles_post_ra>
